<compile_context>
chip_gen: v7x
topology: tpu7x:2x2x1
jax: 0.10.0
libtpu: 0.0.40
codegen_flags: <defaults>
</compile_context>

<pallas_src>
import jax
import jax.numpy as jnp
from jax.experimental import pallas as pl
from jax.experimental.pallas import tpu as pltpu


def _identity_kernel(x_ref, o_ref):
    # Straight VMEM tile copy (identity).
    o_ref[...] = x_ref[...]


_LANE_CANDIDATES = (8192, 4096, 2048, 1024, 512, 256, 128)
# ~2 MiB per block; in+out x double-buffering ≈ 8 MiB VMEM — comfortably inside
# the default scoped limit on v5e (16 MiB) and v6e/v7x (32 MiB).
_TARGET_TILE_BYTES = 2 * 1024 * 1024
# Keep at least this many grid steps when the array is big enough, so input
# prefetch and output writeback overlap (and v7x's two TCs both get work).
_MIN_GRID_STEPS = 4


def _choose_layout(n, itemsize):
    """Pick a lane-dense (rows, lanes) view and a tile_rows/grid for it."""
    # Sublane packing granule: 8 for 4-byte, 16 for 2-byte, 32 for 1-byte.
    granule = max(8, 32 // max(1, itemsize))

    # Prefer the widest lane count that (a) divides the element count exactly
    # (no padding, no extra copies) and (b) leaves at least `granule` rows so
    # blocks are (granule, 128k)-tileable.  Fall back to any dividing width
    # (full-extent single block, still legal).
    lanes = next((l for l in _LANE_CANDIDATES
                  if n % l == 0 and n // l >= granule), None)
    if lanes is None:
        lanes = next((l for l in _LANE_CANDIDATES if n >= l and n % l == 0),
                     None)
        if lanes is None:
            return None
        rows = n // lanes
        return rows, lanes, rows, 1  # tiny tensor: one full-extent block

    rows = n // lanes

    # Target ~2 MiB blocks (amortizes the ~0.35 us per-grid-step overhead).
    target_rows = max(granule,
                      (_TARGET_TILE_BYTES // (lanes * itemsize))
                      // granule * granule)

    # Never let the grid collapse to 1 step on sizable arrays: cap tile_rows so
    # we get >= _MIN_GRID_STEPS steps and the pipeline actually overlaps
    # read-DMA, VMEM copy, and write-DMA (and both v7x TCs stay busy).
    if rows >= granule * _MIN_GRID_STEPS:
        cap = max(granule, (rows // _MIN_GRID_STEPS) // granule * granule)
        target_rows = min(target_rows, cap)

    tile_rows = min(target_rows, rows)

    # Prefer a granule-multiple tile that exactly divides rows: every block
    # stays on the unmasked vst path (no masked partial edge block).
    t = (tile_rows // granule) * granule
    while t >= granule and rows % t != 0:
        t -= granule
    if t >= granule:
        tile_rows = t

    grid = pl.cdiv(rows, tile_rows)
    return rows, lanes, tile_rows, grid


def _pallas_identity(x):
    """Identity implemented as a lane-dense tiled Pallas copy."""
    n = x.size
    itemsize = jnp.dtype(x.dtype).itemsize

    layout = _choose_layout(n, itemsize)
    if layout is None:
        # No clean lane-dense view: the op is a pure identity anyway.
        return x

    rows, lanes, tile_rows, grid = layout
    x2d = x.reshape(rows, lanes)  # free view of contiguous data

    out2d = pl.pallas_call(
        _identity_kernel,
        out_shape=jax.ShapeDtypeStruct((rows, lanes), x.dtype),
        grid=(grid,),
        in_specs=[pl.BlockSpec((tile_rows, lanes), lambda i: (i, 0))],
        out_specs=pl.BlockSpec((tile_rows, lanes), lambda i: (i, 0)),
        cost_estimate=pl.CostEstimate(
            flops=0, transcendentals=0, bytes_accessed=2 * n * itemsize),
        compiler_params=pltpu.CompilerParams(
            dimension_semantics=("parallel",)),
    )(x2d)

    return out2d.reshape(x.shape)


def pallas_print(x, *, force_copy=False):
    """Reproduces Print.forward: prints x.shape, returns x unchanged.

    Default path emits no kernel at all (pure identity -> zero HBM traffic),
    which is the correct translation of this module.  Pass force_copy=True to
    route through the Pallas identity-copy kernel instead.
    """
    # `print(x.shape)` from the PyTorch module — the shape is static, so print
    # it here.  (Under jit this fires once per compilation; wrap in
    # jax.debug.callback if strict per-call printing is required.)
    print(tuple(x.shape))

    if not force_copy:
        return x
    return _pallas_identity(x)


if __name__ == "__main__":
    key = jax.random.PRNGKey(0)
    x = jax.random.normal(key, (2, 4, 16, 16), dtype=jnp.float32)

    # Hot path: identity with no kernel launch.
    y_fast = jax.block_until_ready(pallas_print(x))
    assert y_fast.shape == x.shape and y_fast.dtype == x.dtype
    assert bool(jnp.all(y_fast == x))

    # Validate the Pallas identity-copy kernel on TPU as well.
    y_kernel = jax.block_until_ready(pallas_print(x, force_copy=True))
    assert y_kernel.shape == x.shape and y_kernel.dtype == x.dtype
    assert bool(jnp.all(y_kernel == x))

    print("KERNEL_OK")
</pallas_src>

<mosaic_0001>
module attributes {stable_mosaic.version = 11 : i64} {
  func.func @_identity_kernel(%arg0: i32, %arg1: memref<8x256xf32, #tpu.memory_space<vmem>>, %arg2: memref<8x256xf32, #tpu.memory_space<vmem>>) attributes {dimension_semantics = [#tpu.dimension_semantics<parallel>], iteration_bounds = array<i64: 1>, scalar_prefetch = 0 : i64, scratch_operands = 0 : i64, tpu.core_type = #tpu.core_type<tc>, window_params = [{transform_indices = @transform_0, window_bounds = array<i64: 8, 256>}, {transform_indices = @transform_1, window_bounds = array<i64: 8, 256>}]} {
    %c0 = arith.constant 0 : index
    %c0_0 = arith.constant 0 : index
    %0 = vector.load %arg1[%c0, %c0_0] : memref<8x256xf32, #tpu.memory_space<vmem>>, vector<8x256xf32>
    %c0_1 = arith.constant 0 : index
    %c0_2 = arith.constant 0 : index
    %1 = vector.load %arg2[%c0_1, %c0_2] : memref<8x256xf32, #tpu.memory_space<vmem>>, vector<8x256xf32>
    tpu.vector_store %arg2[%c0_1, %c0_2], %0 {strides = array<i32>} : memref<8x256xf32, #tpu.memory_space<vmem>>, vector<8x256xf32>,
    return
  }
  func.func @transform_0(%arg0: i32) -> (i32, i32) {
    %c0_i32 = arith.constant 0 : i32
    %c0_i32_0 = arith.constant 0 : i32
    return %arg0, %c0_i32 : i32, i32
  }
  func.func @transform_1(%arg0: i32) -> (i32, i32) {
    %c0_i32 = arith.constant 0 : i32
    %c0_i32_0 = arith.constant 0 : i32
    return %arg0, %c0_i32 : i32, i32
  }
}

</mosaic_0001>

<bundles_post_ra>
// kernel: tpu_custom_call.1
= control target key start
LH: loop header
LB: loop body
LE: loop exit
PB: predicated region body
PF: predicated region fallthrough
CT: control target
= control target key end

     0   :  { %6 = vsyncpa [#allocation3], 0  ;;  %s126_s0 = inlined_call_operand.hbm [shape: f32[8,256], index: 0, kind: input, shape index: {}]   ;;  %s127_s1 = inlined_call_operand.hbm [shape: f32[8,256], index: 1, kind: output, shape index: {}]  }
   0x1   :  { %7 = vsyncpa [#allocation4], 0  ;;  %s90_s6 = smov [#allocation2]   ;;  %s42_s10 = scalar_lea.hbm %s126_s0, 256 }
   0x2   :  { %s14_s7 = sshll.u32 %s90_s6, 4  ;;  %p43_p0 = scmp.ne.s32.totalorder %s126_s0, %s42_s10  ;;  %s15_s7 = int_to_ptr.vmem [resolvable:$true] %s14_s7 }
   0x3   :  { %p46_p1 = scmp.lt.u32.totalorder %s42_s10, %s126_s0 }
   0x5   :  { %p48_p2 = pnand %p46_p1, %p43_p0 }
   0x7   :  { %51 = shalt.err (!%p48_p2)
}
   0x8   :  { %s52_s15 = scalar_lea.vmem %s15_s7, 256  ;;  %p57_p4 = scmp.lt.s32.totalorder %s15_s7, %s15_s7 }
   0x9   :  { %p53_p3 = scmp.ne.s32.totalorder %s15_s7, %s52_s15  ;;  %p58_p5 = scmp.lt.s32.totalorder %s52_s15, %s52_s15 }
   0xb   :  { %p59_p6 = por %p58_p5, %p57_p4 }
   0xd   :  { %p60_p7 = pnand %p59_p6, %p53_p3 }
   0xf   :  { %63 = shalt.err (!%p60_p7)
}
  0x10   :  { %17 = dma.hbm_to_vmem [thread:$0]  %s126_s0, 256, %s15_s7, [#allocation3]  }
  0x11   :  { %86 = dma.done.wait [#allocation3], 256  }
  0x12   :  { %87 = vsyncadd [#allocation3], 4294967040  ;;  %s91_s18 = smov [#allocation5]   ;;  %v21_v0 = vld [vmem:[#allocation2] sm:$0xff]  ;;  %v22_v1 = vld [vmem:[#allocation2 + $0x8] sm:$0xff] }
  0x13   :  { %s31_s19 = sshll.u32 %s91_s18, 4  ;;  %23 = vst [vmem:[#allocation5] sm:$0xff] %v21_v0  ;;  %24 = vst [vmem:[#allocation5 + $0x8] sm:$0xff] %v22_v1  ;;  %s32_s19 = int_to_ptr.vmem [resolvable:$true] %s31_s19 }
  0x14   :  { %s64_s20 = scalar_lea.vmem %s32_s19, 256  ;;  %p69_p9 = scmp.lt.s32.totalorder %s32_s19, %s32_s19 }
  0x15   :  { %p65_p8 = scmp.ne.s32.totalorder %s32_s19, %s64_s20  ;;  %p70_p10 = scmp.lt.s32.totalorder %s64_s20, %s64_s20 }
  0x17   :  { %p71_p11 = por %p70_p10, %p69_p9 }
  0x19   :  { %p72_p12 = pnand %p71_p11, %p65_p8 }
  0x1b   :  { %75 = shalt.err (!%p72_p12)
}
  0x1c   :  { %s76_s0 = scalar_lea.hbm %s127_s1, 256 }
  0x1d   :  { %p77_p13 = scmp.ne.s32.totalorder %s127_s1, %s76_s0  ;;  %p80_p0 = scmp.lt.u32.totalorder %s76_s0, %s127_s1 }
  0x1f   :  { %p82_p1 = pnand %p80_p0, %p77_p13 }
  0x21   :  { %85 = shalt.err (!%p82_p1)
}
  0x22   :  { %34 = dma.vmem_to_hbm [thread:$0]  %s32_s19, 256, %s127_s1, [#allocation4]  }
  0x23   :  { %88 = dma.done.wait [#allocation4], 256  }
  0x24   :  { %89 = vsyncadd [#allocation4], 4294967040 }
  0x25   :  { %38 = vsyncpa [#allocation3], 1 }
  0x26   :  { %39 = vsyncpa [#allocation4], 1 }

</bundles_post_ra>
